<compile_context>
chip_gen: v7x
topology: tpu7x:2x2x1
jax: 0.10.0
libtpu: 0.0.40
codegen_flags: <defaults>
</compile_context>

<pallas_src>
import functools

import jax
import jax.numpy as jnp
from jax.experimental import pallas as pl
from jax.experimental.pallas import tpu as pltpu


def _round_up(x, m):
    return ((x + m - 1) // m) * m


def _choose_tiles(B, N, D, itemsize, target_bytes=2 * 1024 * 1024):
    """Pick (graphs_per_step, node_tile) so one nf block is ~target_bytes."""
    per_node = max(1, D * itemsize)
    if N * per_node <= target_bytes or N <= 8:
        tn = N                                   # whole graph in one node tile
    else:
        tn = min(N, max(8, (target_bytes // per_node) // 8 * 8))
    per_graph = max(1, tn * per_node)
    g = max(8, (target_bytes // per_graph) // 8 * 8)
    if B >= 8:
        g = min(g, (B // 8) * 8)                 # block never exceeds the batch
    else:
        g = 8                                    # minimum sublane-aligned block
    # Prefer >=2 grid steps over the batch axis when each half still moves a
    # sizeable block: v7x has 2 TensorCores and the batch axis is "parallel".
    half = _round_up(max(1, (B + 1) // 2), 8)
    if 8 <= half < g and half * per_graph >= 256 * 1024:
        g = half
    return g, tn


def _readout_kernel(counts_ref, nf_ref, w_ref, b_ref, out_ref,
                    m_sc, l_sc, acc_sc, max_sc, *, use_attention):
    ni = pl.program_id(1)
    n_steps = pl.num_programs(1)

    @pl.when(ni == 0)
    def _init():
        acc_sc[...] = jnp.zeros_like(acc_sc)
        max_sc[...] = jnp.full_like(max_sc, -jnp.inf)
        if use_attention:
            m_sc[...] = jnp.full_like(m_sc, -jnp.inf)
            l_sc[...] = jnp.zeros_like(l_sc)

    x = nf_ref[...].astype(jnp.float32)                 # [G, TN, D], f32 accum
    G, TN, D = x.shape
    cnt = counts_ref[...]                               # [G, 1] i32

    node_idx = ni * TN + jax.lax.broadcasted_iota(jnp.int32, (G, TN, 1), 1)
    valid = node_idx < cnt[:, None, :]                  # [G, TN, 1]

    # Zero invalid rows so garbage from partial (out-of-bounds) blocks never
    # reaches an accumulator (0 * garbage would otherwise NaN-poison).
    xz = jnp.where(valid, x, 0.0)                       # [G, TN, D]

    # Running feature max (shared by both branches).
    tile_max = jnp.max(jnp.where(valid, x, -jnp.inf), axis=1)      # [G, D]
    max_sc[...] = jnp.maximum(max_sc[...], tile_max)

    if use_attention:
        # Per-node score = dot(x_n, w) + b on the VPU/XLU (lane-dense [1, D]
        # weight row, lane reduce) — no MXU round trip.
        scores = jnp.sum(xz * w_ref[...], axis=-1, keepdims=True) + b_ref[...]
        scores = jnp.where(valid, scores, -jnp.inf)                 # [G, TN, 1]

        # Online softmax accumulation across node tiles.
        tile_m = jnp.max(scores, axis=1)                            # [G, 1]
        m_new = jnp.maximum(m_sc[...], tile_m)                      # [G, 1]
        m_safe = jnp.where(m_new > -jnp.inf, m_new, 0.0)            # empty guard
        alpha = jnp.exp(m_sc[...] - m_safe)                         # 0 if old=-inf
        e = jnp.exp(scores - m_safe[:, None, :])                    # [G, TN, 1]
        l_sc[...] = alpha * l_sc[...] + jnp.sum(e, axis=1)          # [G, 1]
        acc_sc[...] = alpha * acc_sc[...] + jnp.sum(e * xz, axis=1)  # [G, D]
        m_sc[...] = m_new
    else:
        acc_sc[...] = acc_sc[...] + jnp.sum(xz, axis=1)             # [G, D]

    @pl.when(ni == n_steps - 1)
    def _finalize():
        if use_attention:
            denom = jnp.where(l_sc[...] > 0.0, l_sc[...], 1.0)      # empty guard
            first = acc_sc[...] * (1.0 / denom)                     # G divides
        else:
            n_safe = jnp.maximum(cnt, 1).astype(jnp.float32)        # [G, 1]
            first = acc_sc[...] * (1.0 / n_safe)                    # G divides
        # Static-slice stores (no lane concatenate / extra VMEM temp).
        out_ref[:, :D] = first.astype(out_ref.dtype)
        out_ref[:, D:] = max_sc[...].astype(out_ref.dtype)


def readout(nf, counts, w, b, *, use_attention, graphs_per_step=None,
            node_tile=None):
    """nf: [B, N, D], counts: [B] i32, w: [1, D], b: [1, 1] -> [B, 2D] f32."""
    B, N, D = nf.shape
    itemsize = jnp.dtype(nf.dtype).itemsize
    g_auto, tn_auto = _choose_tiles(B, N, D, itemsize)
    G = int(graphs_per_step) if graphs_per_step is not None else g_auto
    TN = int(node_tile) if node_tile is not None else tn_auto

    # Only tiny batches (B < one sublane-aligned block) pad nf; otherwise the
    # last partial batch block reads past the end and is masked by count == 0.
    if B < G:
        nf_in = jnp.pad(nf, ((0, G - B), (0, 0), (0, 0)))
        rows = G
    else:
        nf_in = nf
        rows = B

    b_steps = pl.cdiv(rows, G)
    n_steps = pl.cdiv(N, TN)

    # counts is tiny (4*B bytes): pad it so every batch-block row has a valid
    # count (0 for the padding graphs -> fully masked, rows discarded below).
    counts_pad = b_steps * G
    counts_p = counts.astype(jnp.int32)
    if counts_pad != B:
        counts_p = jnp.concatenate(
            [counts_p, jnp.zeros((counts_pad - B,), jnp.int32)], axis=0)
    counts2d = counts_p.reshape(counts_pad, 1)

    w_row = jnp.asarray(w, jnp.float32).reshape(1, D)
    b2d = jnp.asarray(b, jnp.float32).reshape(1, 1)

    kernel = functools.partial(_readout_kernel, use_attention=use_attention)
    out = pl.pallas_call(
        kernel,
        out_shape=jax.ShapeDtypeStruct((rows, 2 * D), jnp.float32),
        grid_spec=pltpu.PrefetchScalarGridSpec(
            num_scalar_prefetch=0,
            grid=(b_steps, n_steps),
            in_specs=[
                pl.BlockSpec((G, 1), lambda bi, ni: (bi, 0)),        # counts
                pl.BlockSpec((G, TN, D), lambda bi, ni: (bi, ni, 0)),  # node feats
                pl.BlockSpec((1, D), lambda bi, ni: (0, 0)),         # linear weight
                pl.BlockSpec((1, 1), lambda bi, ni: (0, 0)),         # linear bias
            ],
            out_specs=pl.BlockSpec((G, 2 * D), lambda bi, ni: (bi, 0)),
            scratch_shapes=[
                pltpu.VMEM((G, 1), jnp.float32),   # running softmax max
                pltpu.VMEM((G, 1), jnp.float32),   # running softmax denom
                pltpu.VMEM((G, D), jnp.float32),   # running (weighted) sum
                pltpu.VMEM((G, D), jnp.float32),   # running feature max
            ],
        ),
        compiler_params=pltpu.CompilerParams(
            dimension_semantics=("parallel", "arbitrary"),
            # Above v5e's 16 MiB default scoped limit, below v7x's 64 MiB VMEM.
            vmem_limit_bytes=48 * 1024 * 1024,
        ),
    )(counts2d, nf_in, w_row, b2d)
    return out[:B]


def readout_reference(nf, counts, w, b, *, use_attention):
    """Pure-JAX reference mirroring the PyTorch/DGL semantics."""
    B, N, D = nf.shape
    nf = nf.astype(jnp.float32)
    valid = jnp.arange(N)[None, :, None] < counts[:, None, None]    # [B, N, 1]
    if use_attention:
        scores = jnp.einsum("bnd,od->bno", nf, w) + b                # [B, N, 1]
        scores = jnp.where(valid, scores, -jnp.inf)
        weights = jax.nn.softmax(scores, axis=1)
        first = jnp.sum(weights * nf, axis=1)                        # [B, D]
    else:
        first = jnp.sum(jnp.where(valid, nf, 0.0), axis=1) / counts[
            :, None].astype(jnp.float32)
    max_rd = jnp.max(jnp.where(valid, nf, -jnp.inf), axis=1)         # [B, D]
    return jnp.concatenate([first, max_rd], axis=1)


if __name__ == "__main__":
    key = jax.random.PRNGKey(0)
    k_w, k_b, k1, k2, k3 = jax.random.split(key, 5)

    D = 32  # hid_dim
    # nn.Linear(hid_dim, 1): weight [1, D], bias stored as [1, 1]
    w = jax.random.normal(k_w, (1, D), dtype=jnp.float32) / jnp.sqrt(D)
    b = jax.random.normal(k_b, (1, 1), dtype=jnp.float32) * 0.1

    cases = [
        # Case 1: tiny batch (B=2, N=8) — single grid step.
        (jax.random.normal(k1, (2, 8, D), dtype=jnp.float32),
         jnp.array([8, 5], jnp.int32), {}),
        # Case 2: B=11 — batch not a multiple of the block (partial batch block,
        # no nf padding).
        (jax.random.normal(k2, (11, 8, D), dtype=jnp.float32),
         jnp.array([8, 5, 3, 8, 1, 7, 2, 6, 4, 8, 5], jnp.int32), {}),
        # Case 3: N=20 with node_tile=8 — exercises the online-softmax /
        # running-max accumulators across 3 inner grid steps, with the last
        # node tile reading past N.
        (jax.random.normal(k3, (5, 20, D), dtype=jnp.float32),
         jnp.array([20, 13, 7, 1, 16], jnp.int32),
         dict(graphs_per_step=8, node_tile=8)),
    ]

    ok = True
    for nf, counts, kw in cases:
        for use_attention in (True, False):
            out = jax.block_until_ready(
                readout(nf, counts, w, b, use_attention=use_attention, **kw))
            ref = readout_reference(nf, counts, w, b, use_attention=use_attention)
            if out.shape != ref.shape or not bool(
                    jnp.allclose(out, ref, atol=1e-5, rtol=1e-5)):
                ok = False

    if ok:
        print("KERNEL_OK")
</pallas_src>

<mosaic_0001>
module attributes {stable_mosaic.version = 11 : i64} {
  func.func @_readout_kernel(%arg0: i32, %arg1: i32, %arg2: memref<8x1xi32, #tpu.memory_space<vmem>>, %arg3: memref<8x8x32xf32, #tpu.memory_space<vmem>>, %arg4: memref<1x32xf32, #tpu.memory_space<vmem>>, %arg5: memref<1x1xf32, #tpu.memory_space<vmem>>, %arg6: memref<8x64xf32, #tpu.memory_space<vmem>>, %arg7: memref<8x1xf32, #tpu.memory_space<vmem>>, %arg8: memref<8x1xf32, #tpu.memory_space<vmem>>, %arg9: memref<8x32xf32, #tpu.memory_space<vmem>>, %arg10: memref<8x32xf32, #tpu.memory_space<vmem>>) attributes {dimension_semantics = [#tpu.dimension_semantics<parallel>, #tpu.dimension_semantics<arbitrary>], iteration_bounds = array<i64: 1, 1>, scalar_prefetch = 0 : i64, scratch_operands = 4 : i64, tpu.core_type = #tpu.core_type<tc>, window_params = [{transform_indices = @transform_0, window_bounds = array<i64: 8, 1>}, {transform_indices = @transform_1, window_bounds = array<i64: 8, 8, 32>}, {pipeline_mode = #tpu.pipeline_mode<synchronous>, transform_indices = @transform_2, window_bounds = array<i64: 1, 32>}, {pipeline_mode = #tpu.pipeline_mode<synchronous>, transform_indices = @transform_3, window_bounds = array<i64: 1, 1>}, {transform_indices = @transform_4, window_bounds = array<i64: 8, 64>}]} {
    %c0_i32 = arith.constant 0 : i32
    %0 = arith.cmpi eq, %arg1, %c0_i32 : i32
    %1 = arith.extui %0 : i1 to i32
    %c0_i32_0 = arith.constant 0 : i32
    %2 = arith.cmpi ne, %1, %c0_i32_0 : i32
    scf.if %2 {
      %cst_38 = arith.constant 0.000000e+00 : f32
      %67 = vector.broadcast %cst_38 : f32 to vector<8x32xf32>
      %c0_39 = arith.constant 0 : index
      %c0_40 = arith.constant 0 : index
      %68 = vector.load %arg9[%c0_39, %c0_40] : memref<8x32xf32, #tpu.memory_space<vmem>>, vector<8x32xf32>
      tpu.vector_store %arg9[%c0_39, %c0_40], %67 {strides = array<i32>} : memref<8x32xf32, #tpu.memory_space<vmem>>, vector<8x32xf32>,
      %cst_41 = arith.constant 0xFF800000 : f32
      %69 = vector.broadcast %cst_41 : f32 to vector<8x32xf32>
      %c0_42 = arith.constant 0 : index
      %c0_43 = arith.constant 0 : index
      %70 = vector.load %arg10[%c0_42, %c0_43] : memref<8x32xf32, #tpu.memory_space<vmem>>, vector<8x32xf32>
      tpu.vector_store %arg10[%c0_42, %c0_43], %69 {strides = array<i32>} : memref<8x32xf32, #tpu.memory_space<vmem>>, vector<8x32xf32>,
      %cst_44 = arith.constant 0xFF800000 : f32
      %71 = vector.broadcast %cst_44 : f32 to vector<8x1xf32>
      %c0_45 = arith.constant 0 : index
      %c0_46 = arith.constant 0 : index
      %72 = vector.load %arg7[%c0_45, %c0_46] : memref<8x1xf32, #tpu.memory_space<vmem>>, vector<8x1xf32>
      tpu.vector_store %arg7[%c0_45, %c0_46], %71 {strides = array<i32>} : memref<8x1xf32, #tpu.memory_space<vmem>>, vector<8x1xf32>,
      %cst_47 = arith.constant 0.000000e+00 : f32
      %73 = vector.broadcast %cst_47 : f32 to vector<8x1xf32>
      %c0_48 = arith.constant 0 : index
      %c0_49 = arith.constant 0 : index
      %74 = vector.load %arg8[%c0_48, %c0_49] : memref<8x1xf32, #tpu.memory_space<vmem>>, vector<8x1xf32>
      tpu.vector_store %arg8[%c0_48, %c0_49], %73 {strides = array<i32>} : memref<8x1xf32, #tpu.memory_space<vmem>>, vector<8x1xf32>,
    } else {
    }
    %c0 = arith.constant 0 : index
    %c0_1 = arith.constant 0 : index
    %c0_2 = arith.constant 0 : index
    %3 = vector.load %arg3[%c0, %c0_1, %c0_2] : memref<8x8x32xf32, #tpu.memory_space<vmem>>, vector<8x8x32xf32>
    %c0_3 = arith.constant 0 : index
    %c0_4 = arith.constant 0 : index
    %4 = vector.load %arg2[%c0_3, %c0_4] : memref<8x1xi32, #tpu.memory_space<vmem>>, vector<8x1xi32>
    %c8_i32 = arith.constant 8 : i32
    %5 = arith.muli %arg1, %c8_i32 : i32
    %6 = tpu.iota {dimensions = array<i32: 1>} : vector<8x8x1xi32>
    %7 = vector.broadcast %5 : i32 to vector<8x8x1xi32>
    %8 = arith.addi %7, %6 : vector<8x8x1xi32>
    %9 = vector.shape_cast %4 : vector<8x1xi32> to vector<8x1x1xi32>
    %10 = vector.broadcast %9 : vector<8x1x1xi32> to vector<8x8x1xi32>
    %11 = arith.cmpi slt, %8, %10 : vector<8x8x1xi32>
    %cst = arith.constant 0.000000e+00 : f32
    %12 = vector.shape_cast %11 : vector<8x8x1xi1> to vector<8x8x1xi1>
    %13 = vector.broadcast %12 : vector<8x8x1xi1> to vector<8x8x32xi1>
    %14 = vector.broadcast %cst : f32 to vector<8x8x32xf32>
    %15 = arith.select %13, %3, %14 : vector<8x8x32xi1>, vector<8x8x32xf32>
    %cst_5 = arith.constant 0xFF800000 : f32
    %16 = vector.shape_cast %11 : vector<8x8x1xi1> to vector<8x8x1xi1>
    %17 = vector.broadcast %16 : vector<8x8x1xi1> to vector<8x8x32xi1>
    %18 = vector.broadcast %cst_5 : f32 to vector<8x8x32xf32>
    %19 = arith.select %17, %3, %18 : vector<8x8x32xi1>, vector<8x8x32xf32>
    %cst_6 = arith.constant dense<0xFF800000> : vector<8x32xf32>
    %20 = vector.multi_reduction <maximumf>, %19, %cst_6 [1] : vector<8x8x32xf32> to vector<8x32xf32>
    %c0_7 = arith.constant 0 : index
    %c0_8 = arith.constant 0 : index
    %21 = vector.load %arg10[%c0_7, %c0_8] : memref<8x32xf32, #tpu.memory_space<vmem>>, vector<8x32xf32>
    %22 = arith.maximumf %21, %20 : vector<8x32xf32>
    %c0_9 = arith.constant 0 : index
    %c0_10 = arith.constant 0 : index
    %23 = vector.load %arg10[%c0_9, %c0_10] : memref<8x32xf32, #tpu.memory_space<vmem>>, vector<8x32xf32>
    tpu.vector_store %arg10[%c0_9, %c0_10], %22 {strides = array<i32>} : memref<8x32xf32, #tpu.memory_space<vmem>>, vector<8x32xf32>,
    %c0_11 = arith.constant 0 : index
    %c0_12 = arith.constant 0 : index
    %24 = vector.load %arg4[%c0_11, %c0_12] : memref<1x32xf32, #tpu.memory_space<vmem>>, vector<1x32xf32>
    %25 = vector.shape_cast %24 : vector<1x32xf32> to vector<1x1x32xf32>
    %26 = vector.broadcast %25 : vector<1x1x32xf32> to vector<8x8x32xf32>
    %27 = arith.mulf %15, %26 : vector<8x8x32xf32>
    %cst_13 = arith.constant dense<0.000000e+00> : vector<8x8xf32>
    %28 = vector.multi_reduction <add>, %27, %cst_13 [2] : vector<8x8x32xf32> to vector<8x8xf32>
    %29 = vector.shape_cast %28 : vector<8x8xf32> to vector<8x8x1xf32>
    %c0_14 = arith.constant 0 : index
    %c0_15 = arith.constant 0 : index
    %30 = vector.load %arg5[%c0_14, %c0_15] : memref<1x1xf32, #tpu.memory_space<vmem>>, vector<1x1xf32>
    %31 = vector.shape_cast %30 : vector<1x1xf32> to vector<1x1x1xf32>
    %32 = vector.broadcast %31 : vector<1x1x1xf32> to vector<8x8x1xf32>
    %33 = arith.addf %29, %32 : vector<8x8x1xf32>
    %cst_16 = arith.constant 0xFF800000 : f32
    %34 = vector.broadcast %cst_16 : f32 to vector<8x8x1xf32>
    %35 = arith.select %11, %33, %34 : vector<8x8x1xi1>, vector<8x8x1xf32>
    %cst_17 = arith.constant dense<0xFF800000> : vector<8x1xf32>
    %36 = vector.multi_reduction <maximumf>, %35, %cst_17 [1] : vector<8x8x1xf32> to vector<8x1xf32>
    %c0_18 = arith.constant 0 : index
    %c0_19 = arith.constant 0 : index
    %37 = vector.load %arg7[%c0_18, %c0_19] : memref<8x1xf32, #tpu.memory_space<vmem>>, vector<8x1xf32>
    %38 = arith.maximumf %37, %36 : vector<8x1xf32>
    %cst_20 = arith.constant 0xFF800000 : f32
    %39 = vector.broadcast %cst_20 : f32 to vector<8x1xf32>
    %40 = arith.cmpf ogt, %38, %39 : vector<8x1xf32>
    %cst_21 = arith.constant 0.000000e+00 : f32
    %41 = vector.broadcast %cst_21 : f32 to vector<8x1xf32>
    %42 = arith.select %40, %38, %41 : vector<8x1xi1>, vector<8x1xf32>
    %c0_22 = arith.constant 0 : index
    %c0_23 = arith.constant 0 : index
    %43 = vector.load %arg7[%c0_22, %c0_23] : memref<8x1xf32, #tpu.memory_space<vmem>>, vector<8x1xf32>
    %44 = arith.subf %43, %42 : vector<8x1xf32>
    %45 = math.exp %44 : vector<8x1xf32>
    %46 = vector.shape_cast %42 : vector<8x1xf32> to vector<8x1x1xf32>
    %47 = vector.broadcast %46 : vector<8x1x1xf32> to vector<8x8x1xf32>
    %48 = arith.subf %35, %47 : vector<8x8x1xf32>
    %49 = math.exp %48 : vector<8x8x1xf32>
    %c0_24 = arith.constant 0 : index
    %c0_25 = arith.constant 0 : index
    %50 = vector.load %arg8[%c0_24, %c0_25] : memref<8x1xf32, #tpu.memory_space<vmem>>, vector<8x1xf32>
    %51 = arith.mulf %45, %50 : vector<8x1xf32>
    %cst_26 = arith.constant dense<0.000000e+00> : vector<8x1xf32>
    %52 = vector.multi_reduction <add>, %49, %cst_26 [1] : vector<8x8x1xf32> to vector<8x1xf32>
    %53 = arith.addf %51, %52 : vector<8x1xf32>
    %c0_27 = arith.constant 0 : index
    %c0_28 = arith.constant 0 : index
    %54 = vector.load %arg8[%c0_27, %c0_28] : memref<8x1xf32, #tpu.memory_space<vmem>>, vector<8x1xf32>
    tpu.vector_store %arg8[%c0_27, %c0_28], %53 {strides = array<i32>} : memref<8x1xf32, #tpu.memory_space<vmem>>, vector<8x1xf32>,
    %c0_29 = arith.constant 0 : index
    %c0_30 = arith.constant 0 : index
    %55 = vector.load %arg9[%c0_29, %c0_30] : memref<8x32xf32, #tpu.memory_space<vmem>>, vector<8x32xf32>
    %56 = vector.broadcast %45 : vector<8x1xf32> to vector<8x32xf32>
    %57 = arith.mulf %56, %55 : vector<8x32xf32>
    %58 = vector.broadcast %49 : vector<8x8x1xf32> to vector<8x8x32xf32>
    %59 = arith.mulf %58, %15 : vector<8x8x32xf32>
    %cst_31 = arith.constant dense<0.000000e+00> : vector<8x32xf32>
    %60 = vector.multi_reduction <add>, %59, %cst_31 [1] : vector<8x8x32xf32> to vector<8x32xf32>
    %61 = arith.addf %57, %60 : vector<8x32xf32>
    %c0_32 = arith.constant 0 : index
    %c0_33 = arith.constant 0 : index
    %62 = vector.load %arg9[%c0_32, %c0_33] : memref<8x32xf32, #tpu.memory_space<vmem>>, vector<8x32xf32>
    tpu.vector_store %arg9[%c0_32, %c0_33], %61 {strides = array<i32>} : memref<8x32xf32, #tpu.memory_space<vmem>>, vector<8x32xf32>,
    %c0_34 = arith.constant 0 : index
    %c0_35 = arith.constant 0 : index
    %63 = vector.load %arg7[%c0_34, %c0_35] : memref<8x1xf32, #tpu.memory_space<vmem>>, vector<8x1xf32>
    tpu.vector_store %arg7[%c0_34, %c0_35], %38 {strides = array<i32>} : memref<8x1xf32, #tpu.memory_space<vmem>>, vector<8x1xf32>,
    %c0_i32_36 = arith.constant 0 : i32
    %64 = arith.cmpi eq, %arg1, %c0_i32_36 : i32
    %65 = arith.extui %64 : i1 to i32
    %c0_i32_37 = arith.constant 0 : i32
    %66 = arith.cmpi ne, %65, %c0_i32_37 : i32
    scf.if %66 {
      %c0_38 = arith.constant 0 : index
      %c0_39 = arith.constant 0 : index
      %67 = vector.load %arg8[%c0_38, %c0_39] : memref<8x1xf32, #tpu.memory_space<vmem>>, vector<8x1xf32>
      %cst_40 = arith.constant 0.000000e+00 : f32
      %68 = vector.broadcast %cst_40 : f32 to vector<8x1xf32>
      %69 = arith.cmpf ogt, %67, %68 : vector<8x1xf32>
      %c0_41 = arith.constant 0 : index
      %c0_42 = arith.constant 0 : index
      %70 = vector.load %arg8[%c0_41, %c0_42] : memref<8x1xf32, #tpu.memory_space<vmem>>, vector<8x1xf32>
      %cst_43 = arith.constant 1.000000e+00 : f32
      %71 = vector.broadcast %cst_43 : f32 to vector<8x1xf32>
      %72 = arith.select %69, %70, %71 : vector<8x1xi1>, vector<8x1xf32>
      %c0_44 = arith.constant 0 : index
      %c0_45 = arith.constant 0 : index
      %73 = vector.load %arg9[%c0_44, %c0_45] : memref<8x32xf32, #tpu.memory_space<vmem>>, vector<8x32xf32>
      %cst_46 = arith.constant 1.000000e+00 : f32
      %74 = vector.broadcast %cst_46 : f32 to vector<8x1xf32>
      %75 = arith.divf %74, %72 : vector<8x1xf32>
      %76 = vector.broadcast %75 : vector<8x1xf32> to vector<8x32xf32>
      %77 = arith.mulf %73, %76 : vector<8x32xf32>
      %c0_47 = arith.constant 0 : index
      %c0_48 = arith.constant 0 : index
      %78 = vector.load %arg6[%c0_47, %c0_48] : memref<8x64xf32, #tpu.memory_space<vmem>>, vector<8x32xf32>
      tpu.vector_store %arg6[%c0_47, %c0_48], %77 {strides = array<i32>} : memref<8x64xf32, #tpu.memory_space<vmem>>, vector<8x32xf32>,
      %c0_49 = arith.constant 0 : index
      %c0_50 = arith.constant 0 : index
      %79 = vector.load %arg10[%c0_49, %c0_50] : memref<8x32xf32, #tpu.memory_space<vmem>>, vector<8x32xf32>
      %c0_51 = arith.constant 0 : index
      %c32 = arith.constant 32 : index
      %80 = vector.load %arg6[%c0_51, %c32] : memref<8x64xf32, #tpu.memory_space<vmem>>, vector<8x32xf32>
      tpu.vector_store %arg6[%c0_51, %c32], %79 {strides = array<i32>} : memref<8x64xf32, #tpu.memory_space<vmem>>, vector<8x32xf32>,
    } else {
    }
    return
  }
  func.func @transform_0(%arg0: i32, %arg1: i32) -> (i32, i32) {
    %c0_i32 = arith.constant 0 : i32
    %c0_i32_0 = arith.constant 0 : i32
    return %arg0, %c0_i32 : i32, i32
  }
  func.func @transform_1(%arg0: i32, %arg1: i32) -> (i32, i32, i32) {
    %c0_i32 = arith.constant 0 : i32
    %c0_i32_0 = arith.constant 0 : i32
    return %arg0, %arg1, %c0_i32 : i32, i32, i32
  }
  func.func @transform_2(%arg0: i32, %arg1: i32) -> (i32, i32) {
    %c0_i32 = arith.constant 0 : i32
    %c0_i32_0 = arith.constant 0 : i32
    %c0_i32_1 = arith.constant 0 : i32
    return %c0_i32, %c0_i32_0 : i32, i32
  }
  func.func @transform_3(%arg0: i32, %arg1: i32) -> (i32, i32) {
    %c0_i32 = arith.constant 0 : i32
    %c0_i32_0 = arith.constant 0 : i32
    %c0_i32_1 = arith.constant 0 : i32
    return %c0_i32, %c0_i32_0 : i32, i32
  }
  func.func @transform_4(%arg0: i32, %arg1: i32) -> (i32, i32) {
    %c0_i32 = arith.constant 0 : i32
    %c0_i32_0 = arith.constant 0 : i32
    return %arg0, %c0_i32 : i32, i32
  }
}

</mosaic_0001>

<bundles_post_ra>
// kernel: tpu_custom_call.1
= control target key start
LH: loop header
LB: loop body
LE: loop exit
PB: predicated region body
PF: predicated region fallthrough
CT: control target
= control target key end

     0   :  { %s1201_s0 = inlined_call_operand.vmem [shape: s32[8,1], index: 0, kind: input, shape index: {}]   ;;  %s1202_s1 = inlined_call_operand.hbm [shape: f32[8,8,32], index: 1, kind: input, shape index: {}]   ;;  %s1203_s2 = inlined_call_operand.vmem [shape: f32[1,32], index: 2, kind: input, shape index: {}]   ;;  %s1204_s3 = inlined_call_operand.<no memory space> [shape: f32[1,1], index: 3, kind: input, shape index: {}]   ;;  %s1205_s4 = inlined_call_operand.hbm [shape: f32[8,64], index: 4, kind: output, shape index: {}]  }
   0x1   :  { %v9_v0 = vstv %s1204_s3 }
   0x2   :  { %10 = vst [vmem:[#allocation6] sm:$0x1] %v9_v0 }
   0x3   :  { %11 = vsyncpa [#allocation8], 0 }
   0x4   :  { %12 = vsyncpa [#allocation9], 0  ;;  %s868_s17 = smov [#allocation7]   ;;  %s820_s21 = scalar_lea.hbm %s1202_s1, 1024 }
   0x5   :  { %s20_s18 = sshll.u32 %s868_s17, 4  ;;  %p821_p0 = scmp.ne.s32.totalorder %s1202_s1, %s820_s21  ;;  %s21_s18 = int_to_ptr.vmem [resolvable:$true] %s20_s18 }
   0x6   :  { %p824_p1 = scmp.lt.u32.totalorder %s820_s21, %s1202_s1 }
   0x8   :  { %p826_p2 = pnand %p824_p1, %p821_p0 }
   0xa   :  { %829 = shalt.err (!%p826_p2)
}
   0xb   :  { %s830_s3 = scalar_lea.vmem %s21_s18, 1024  ;;  %p835_p4 = scmp.lt.s32.totalorder %s21_s18, %s21_s18 }
   0xc   :  { %p831_p3 = scmp.ne.s32.totalorder %s21_s18, %s830_s3  ;;  %p836_p5 = scmp.lt.s32.totalorder %s830_s3, %s830_s3 }
   0xe   :  { %p837_p6 = por %p836_p5, %p835_p4 }
  0x10   :  { %p838_p7 = pnand %p837_p6, %p831_p3 }
  0x12   :  { %841 = shalt.err (!%p838_p7)
}
  0x13   :  { %s869_s26 = smov 128   ;;  %s870_s27 = smov 8  }
  0x14   :  { %26 = dma.hbm_to_vmem [thread:$0]  %s1202_s1, 1024, %s21_s18, [#allocation8], %s869_s26, %s869_s26, %s870_s27  }
  0x15   :  { %864 = dma.done.wait [#allocation8], 1024  }
  0x16   :  { %865 = vsyncadd [#allocation8], 4294966272  ;;  %v54_v1 = vlaneseq  ;;  %v871_v2 = vmov 0   ;;  %v872_v3 = vmov 1966171168   ;;  %v52_v8 = vld [vmem:[%s1201_s0] sm:$0xff] }
  0x17   :  { %797 = vset.pattern.permute.xlu0 %v871_v2  ;;  %v60_v4 = vunpack.c.l.s4 %v872_v3  ;;  %798 = vset.pattern.permute.xlu1 %v871_v2  ;;  %v58_v11 = vcombine.high %v52_v8, %v52_v8  ;;  %vm38_vm8 = vcmask 261120   ;;  %v873_v43 = vmov -inf   ;;  %v44_v44 = vld [vmem:[#allocation7] sm:$0xff]  ;;  %v1003_v46 = vld [vmem:[%s1203_s2] ss:$0 sm:$0xff]  ;;  %v46_v47 = vld [vmem:[#allocation7 + $0x10] sm:$0xff] }
  0x18   :  { %v917_v5 = vshrl.u32 %v54_v1, 7  ;;  %40 = vst.msk [vmem:[#allocation5] sm:$0xff] %vm38_vm8, %v873_v43  ;;  %vm41_vm9 = vcmask 7168   ;;  %v45_v52 = vld [vmem:[#allocation7 + $0x8] sm:$0xff]  ;;  %v47_v59 = vld [vmem:[#allocation7 + $0x18] sm:$0xff]  ;;  %vm269_vm14 = vcmask 1041409  }
  0x19   :  { %v61_v6 = vunpack.c.0.s8 %v60_v4  ;;  %42 = vst.msk [vmem:[#allocation2] sm:$0xff] %vm41_vm9, %v873_v43  ;;  %s875_s2 = smov 32   ;;  %s876_s6 = smov [#allocation10]  }
  0x1a   :  { %v927_v10 = vsub.s32 0, %v917_v5  ;;  %s777_s7 = sshll.u32 %s876_s6, 4  ;;  %s778_s7 = int_to_ptr.vmem [resolvable:$true] %s777_s7 }
  0x1b   :  { %v920_v7 = vsub.s32 %v61_v6, %v917_v5  ;;  %s842_s8 = scalar_lea.vmem %s778_s7, 128  ;;  %p847_p9 = scmp.lt.s32.totalorder %s778_s7, %s778_s7 }
  0x1c   :  { %p843_p8 = scmp.ne.s32.totalorder %s778_s7, %s842_s8  ;;  %p848_p10 = scmp.lt.s32.totalorder %s842_s8, %s842_s8 }
  0x1d   :  { %v65_v9 = vrot.slane %v52_v8, %v920_v7  ;;  %v72_v14 = vrot.slane %v58_v11, %v920_v7 }
  0x1e   :  { %p849_p11 = por %p848_p10, %p847_p9 }
  0x1f   :  { %v81_v12 = vrot.slane %v65_v9, %v920_v7  ;;  %v73_v13 = vcombine.high %v65_v9, %v65_v9  ;;  %v88_v18 = vrot.slane %v72_v14, %v920_v7  ;;  %v74_v19 = vcombine.high %v72_v14, %v72_v14  ;;  %v48_v14 = vld [vmem:[#allocation7 + $0x20] sm:$0xff] }
  0x20   :  { %p850_p12 = pnand %p849_p11, %p843_p8 }
  0x21   :  { %v110_v15 = vrot.slane %v81_v12, %v927_v10  ;;  %v103_v16 = vcombine.high %v81_v12, %v81_v12  ;;  %v95_v17 = vrot.slane %v73_v13, %v920_v7  ;;  %v126_v25 = vrot.slane %v88_v18, %v927_v10 }
  0x22   :  { %v102_v26 = vrot.slane %v74_v19, %v920_v7  ;;  %v104_v27 = vcombine.high %v88_v18, %v88_v18 }
  0x23   :  { %vm935_vm0 = vcmp.lt.s32.totalorder %v917_v5, %v110_v15  ;;  %v940_v21 = vrot.slane %v103_v16, %v927_v10  ;;  %v114_v22 = vrot.slane %v95_v17, %v927_v10  ;;  %v105_v23 = vcombine.high %v95_v17, %v95_v17 }
  0x24   :  { %v147_v24 = vsel %vm935_vm0, 1, %v871_v2  ;;  %v130_v32 = vrot.slane %v102_v26, %v927_v10  ;;  %vm966_vm4 = vcmp.lt.s32.totalorder %v917_v5, %v126_v25  ;;  %v971_v34 = vrot.slane %v104_v27, %v927_v10  ;;  %v49_v25 = vld [vmem:[#allocation7 + $0x28] sm:$0xff] }
  0x25   :  { %156 = vperm.xlu0 %797, %v147_v24   ;;  %vm141_vm1 = vcmp.lt.s32.totalorder %v917_v5, %v940_v21  ;;  %vm950_vm2 = vcmp.lt.s32.totalorder %v917_v5, %v114_v22  ;;  %v955_v29 = vrot.slane %v105_v23, %v927_v10  ;;  %v106_v35 = vcombine.high %v102_v26, %v102_v26 }
  0x26   :  { %v149_v30 = vsel %vm141_vm1, 1, %v871_v2  ;;  %v148_v31 = vsel %vm950_vm2, 1, %v871_v2  ;;  %vm977_vm5 = vcmp.lt.s32.totalorder %v917_v5, %v130_v32  ;;  %v151_v39 = vsel %vm966_vm4, 1, %v871_v2 }
  0x27   :  { %162 = vperm.xlu1 %798, %v149_v30   ;;  %vm142_vm3 = vcmp.lt.s32.totalorder %v917_v5, %v955_v29  ;;  %v982_v38 = vrot.slane %v106_v35, %v927_v10  ;;  %vm145_vm6 = vcmp.lt.s32.totalorder %v917_v5, %v971_v34  ;;  %v152_v40 = vsel %vm977_vm5, 1, %v871_v2 }
  0x28   :  { %v150_v36 = vsel %vm142_vm3, 1, %v871_v2  ;;  %v153_v41 = vsel %vm145_vm6, 1, %v871_v2 }
  0x29   :  { %159 = vperm.xlu0 %797, %v148_v31   ;;  %vm146_vm7 = vcmp.lt.s32.totalorder %v917_v5, %v982_v38 }
  0x2a   :  { %v154_v42 = vsel %vm146_vm7, 1, %v871_v2 }
  0x2b   :  { %165 = vperm.xlu1 %798, %v150_v36  }
  0x2d   :  { %168 = vperm.xlu0 %797, %v151_v39  }
  0x2f   :  { %171 = vperm.xlu1 %798, %v152_v40  }
  0x31   :  { %174 = vperm.xlu0 %797, %v153_v41  }
  0x33   :  { %177 = vperm.xlu1 %798, %v154_v42  }
  0xa4   :  { %v157_v45 = vpop.permute.xlu0 %156 }
  0xa5   :  { %vm179_vm10 = vcmp.eq.s32.totalorder %v157_v45, 1 }
  0xa6   :  { %v1005_v48 = vsel %vm179_vm10, %v44_v44, 0.0  ;;  %v195_v49 = vsel %vm179_vm10, %v44_v44, -inf  ;;  %v163_v50 = vpop.permute.xlu1 %162  ;;  %vm271_vm10 = vcmask 1042434   ;;  %v50_v44 = vld [vmem:[#allocation7 + $0x30] sm:$0xff] }
  0xa7   :  { %v204_v51 = vsel %vm38_vm8, %v195_v49, -inf  ;;  %vm181_vm11 = vcmp.eq.s32.totalorder %v163_v50, 1  ;;  %v293_v53 = vmul.f32 %v1003_v46, %v1005_v48 }
  0xa8   :  { %v205_v54 = vrot.slane %v204_v51, 4  ;;  %v1010_v55 = vsel %vm181_vm11, %v46_v47, 0.0  ;;  %v197_v56 = vsel %vm181_vm11, %v46_v47, -inf  ;;  %v160_v57 = vpop.permute.xlu0 %159 }
  0xa9   :  { %v218_v58 = vsel %vm38_vm8, %v197_v56, -inf  ;;  %vm180_vm12 = vcmp.eq.s32.totalorder %v160_v57, 1  ;;  %v301_v60 = vsel %vm38_vm8, %v293_v53, 0.0  ;;  %v295_v61 = vmul.f32 %v1003_v46, %v1010_v55 }
  0xaa   :  { %v206_v62 = vmax.f32 %v204_v51, %v205_v54  ;;  %v219_v63 = vrot.slane %v218_v58, 4  ;;  %v1016_v0 = vsel %vm180_vm12, %v45_v52, 0.0  ;;  %v196_v1 = vsel %vm180_vm12, %v45_v52, -inf  ;;  %v166_v2 = vpop.permute.xlu1 %165  ;;  %302 = vadd.xlane.f32.xlu0 %v301_v60  ;;  %v51_v60 = vld [vmem:[#allocation7 + $0x38] sm:$0xff] }
  0xab   :  { %v211_v3 = vsel %vm38_vm8, %v196_v1, -inf  ;;  %vm182_vm13 = vcmp.eq.s32.totalorder %v166_v2, 1  ;;  %v294_v4 = vmul.f32 %v1003_v46, %v1016_v0  ;;  %v307_v6 = vsel %vm38_vm8, %v295_v61, 0.0 }
  0xac   :  { %v207_v8 = vrot.slane %v206_v62, 2  ;;  %v220_v9 = vmax.f32 %v218_v58, %v219_v63  ;;  %v212_v11 = vrot.slane %v211_v3, 4  ;;  %v1022_v12 = vsel %vm182_vm13, %v47_v59, 0.0  ;;  %v169_v13 = vpop.permute.xlu0 %168 }
  0xad   :  { %v198_v15 = vsel %vm182_vm13, %v47_v59, -inf  ;;  %vm183_vm15 = vcmp.eq.s32.totalorder %v169_v13, 1  ;;  %v304_v16 = vsel %vm38_vm8, %v294_v4, 0.0  ;;  %v1027_v17 = vmul.f32 %v1003_v46, %v1022_v12 }
  0xae   :  { %v208_v18 = vmax.f32 %v206_v62, %v207_v8  ;;  %v221_v19 = vrot.slane %v220_v9, 2  ;;  %v213_v22 = vmax.f32 %v211_v3, %v212_v11  ;;  %v225_v23 = vsel %vm38_vm8, %v198_v15, -inf  ;;  %v172_v24 = vpop.permute.xlu1 %171  ;;  %305 = vadd.xlane.f32.xlu1 %v304_v16  ;;  %308 = vadd.xlane.f32.xlu0 %v307_v6 }
  0xaf   :  { %v226_v26 = vrot.slane %v225_v23, 4  ;;  %v1030_v27 = vsel %vm183_vm15, %v48_v14, 0.0  ;;  %v199_v30 = vsel %vm183_vm15, %v48_v14, -inf  ;;  %vm184_vm11 = vcmp.eq.s32.totalorder %v172_v24, 1 }
  0xb0   :  { %v209_v31 = vrot.slane %v208_v18, 1  ;;  %v222_v32 = vmax.f32 %v220_v9, %v221_v19  ;;  %v214_v35 = vrot.slane %v213_v22, 2  ;;  %vm273_vm12 = vcmask 1043459   ;;  %v175_v39 = vpop.permute.xlu0 %174 }
  0xb1   :  { %v232_v36 = vsel %vm38_vm8, %v199_v30, -inf  ;;  %v227_v40 = vmax.f32 %v225_v23, %v226_v26  ;;  %v1033_v42 = vsel %vm184_vm11, %v49_v25, 0.0  ;;  %v200_v43 = vsel %vm184_vm11, %v49_v25, -inf }
  0xb2   :  { %v233_v41 = vrot.slane %v232_v36, 4  ;;  %v210_v45 = vmax.f32 %v208_v18, %v209_v31  ;;  %v223_v47 = vrot.slane %v222_v32, 1  ;;  %v215_v49 = vmax.f32 %v213_v22, %v214_v35  ;;  %v178_v54 = vpop.permute.xlu1 %177 }
  0xb3   :  { %v239_v50 = vsel %vm38_vm8, %v200_v43, -inf  ;;  %v228_v51 = vrot.slane %v227_v40, 2  ;;  %vm1206_vm13 = vcmask 1044484   ;;  %vm185_vm15 = vcmp.eq.s32.totalorder %v175_v39, 1 }
  0xb4   :  { %v234_v52 = vmax.f32 %v232_v36, %v233_v41  ;;  %v240_v53 = vrot.slane %v239_v50, 4  ;;  %v224_v56 = vmax.f32 %v222_v32, %v223_v47  ;;  %v216_v57 = vrot.slane %v215_v49, 1 }
  0xb5   :  { %v1036_v58 = vsel %vm185_vm15, %v50_v44, 0.0  ;;  %v201_v59 = vsel %vm185_vm15, %v50_v44, -inf  ;;  %v229_v61 = vmax.f32 %v227_v40, %v228_v51  ;;  %vm186_vm11 = vcmp.eq.s32.totalorder %v178_v54, 1 }
  0xb6   :  { %v235_v62 = vrot.slane %v234_v52, 2  ;;  %v241_v63 = vmax.f32 %v239_v50, %v240_v53  ;;  %v246_v1 = vsel %vm38_vm8, %v201_v59, -inf  ;;  %v217_v2 = vmax.f32 %v215_v49, %v216_v57 }
  0xb7   :  { %v247_v3 = vrot.slane %v246_v1, 4  ;;  %v297_v4 = vmul.f32 %v1003_v46, %v1030_v27  ;;  %v230_v6 = vrot.slane %v229_v61, 1  ;;  %v1041_v11 = vsel %vm186_vm11, %v51_v60, 0.0 }
  0xb8   :  { %v236_v8 = vmax.f32 %v234_v52, %v235_v62  ;;  %v242_v9 = vrot.slane %v241_v63, 2  ;;  %v270_v13 = vsel %vm269_vm14, %v217_v2, %v210_v45  ;;  %v202_v15 = vsel %vm186_vm11, %v51_v60, -inf  ;;  %v260_v60 = vld [vmem:[#allocation5] sm:$0xff] }
  0xb9   :  { %v248_v14 = vmax.f32 %v246_v1, %v247_v3  ;;  %v313_v16 = vsel %vm38_vm8, %v297_v4, 0.0  ;;  %v231_v18 = vmax.f32 %v229_v61, %v230_v6  ;;  %v272_v19 = vsel %vm271_vm10, %v224_v56, %v270_v13 }
  0xba   :  { %v237_v22 = vrot.slane %v236_v8, 1  ;;  %v243_v23 = vmax.f32 %v241_v63, %v242_v9  ;;  %314 = vadd.xlane.f32.xlu1 %v313_v16  ;;  %v253_v25 = vsel %vm38_vm8, %v202_v15, -inf  ;;  %v310_v26 = vsel %vm38_vm8, %v1027_v17, 0.0  ;;  %v787_v63 = vld [vmem:[#allocation6] ss:$0 sm:$0xff] }
  0xbb   :  { %v249_v24 = vrot.slane %v248_v14, 2  ;;  %v299_v30 = vmul.f32 %v1003_v46, %v1036_v58  ;;  %v274_v31 = vsel %vm273_vm12, %v231_v18, %v272_v19  ;;  %v254_v36 = vrot.slane %v253_v25, 4  ;;  %311 = vadd.xlane.f32.xlu0 %v310_v26 }
  0xbc   :  { %v238_v32 = vmax.f32 %v236_v8, %v237_v22  ;;  %v244_v35 = vrot.slane %v243_v23, 1  ;;  %v298_v41 = vmul.f32 %v1003_v46, %v1033_v42  ;;  %vm277_vm15 = vcmask 1045509  }
  0xbd   :  { %v250_v39 = vmax.f32 %v248_v14, %v249_v24  ;;  %v319_v40 = vsel %vm38_vm8, %v299_v30, 0.0  ;;  %v255_v44 = vmax.f32 %v253_v25, %v254_v36  ;;  %v300_v49 = vmul.f32 %v1003_v46, %v1041_v11 }
  0xbe   :  { %v245_v43 = vmax.f32 %v243_v23, %v244_v35  ;;  %320 = vadd.xlane.f32.xlu1 %v319_v40  ;;  %v276_v17 = vsel %vm1206_vm13, %v238_v32, %v274_v31  ;;  %v316_v47 = vsel %vm38_vm8, %v298_v41, 0.0  ;;  %vm279_vm11 = vcmask 1046534  }
  0xbf   :  { %v251_v45 = vrot.slane %v250_v39, 1  ;;  %v256_v50 = vrot.slane %v255_v44, 2  ;;  %317 = vadd.xlane.f32.xlu0 %v316_v47  ;;  %v322_v54 = vsel %vm38_vm8, %v300_v49, 0.0  ;;  %vm281_vm13 = vcmask 1047559  }
  0xc0   :  { %v278_v52 = vsel %vm277_vm15, %v245_v43, %v276_v17  ;;  %v874_v46 = vmov 0.0  }
  0xc1   :  { %v252_v51 = vmax.f32 %v250_v39, %v251_v45  ;;  %v257_v53 = vmax.f32 %v255_v44, %v256_v50  ;;  %43 = vst.msk [vmem:[#allocation3] sm:$0xff] %vm41_vm9, %v874_v46 }
  0xc2   :  { %39 = vst.msk [vmem:[#allocation4] sm:$0xff] %vm38_vm8, %v874_v46 }
  0xc3   :  { %v258_v56 = vrot.slane %v257_v53, 1  ;;  %323 = vadd.xlane.f32.xlu0 %v322_v54  ;;  %v280_v57 = vsel %vm279_vm11, %v252_v51, %v278_v52 }
  0xc5   :  { %v259_v59 = vmax.f32 %v257_v53, %v258_v56 }
  0xc7   :  { %v282_v61 = vsel %vm281_vm13, %v259_v59, %v280_v57 }
  0xc8   :  { %v284_v62 = vmax.f32 %v260_v60, %v282_v61 }
  0xca   :  { %285 = vst.msk [vmem:[#allocation5] sm:$0xff] %vm38_vm8, %v284_v62 }
 0x137   :  { %v303_v1 = vpop.xlane.xlu0 %302 }
 0x138   :  { %v332_v2 = vadd.f32 %v787_v63, %v303_v1 }
 0x13a   :  { %v1068_v3 = vsel %vm935_vm0, %v332_v2, -inf  ;;  %vm1215_vm0 = vcmask 1044484  }
 0x13b   :  { %v306_v4 = vpop.xlane.xlu1 %305  ;;  %v309_v6 = vpop.xlane.xlu0 %308  ;;  %v349_v13 = vsel %vm41_vm9, %v1068_v3, -inf }
 0x13c   :  { %v333_v8 = vadd.f32 %v787_v63, %v306_v4  ;;  %v334_v9 = vadd.f32 %v787_v63, %v309_v6  ;;  %v350_v18 = vrot.slane %v349_v13, 4 }
 0x13e   :  { %v1074_v14 = vsel %vm950_vm2, %v333_v8, -inf  ;;  %v1079_v15 = vsel %vm141_vm1, %v334_v9, -inf  ;;  %v351_v24 = vmax.f32 %v349_v13, %v350_v18  ;;  %vm1216_vm2 = vmmov %vm1215_vm0 }
 0x13f   :  { %v356_v20 = vsel %vm41_vm9, %v1074_v14, -inf  ;;  %v363_v16 = vsel %vm41_vm9, %v1079_v15, -inf }
 0x140   :  { %v357_v19 = vrot.slane %v356_v20, 4  ;;  %v364_v22 = vrot.slane %v363_v16, 4  ;;  %v352_v31 = vrot.slane %v351_v24, 2 }
 0x142   :  { %v358_v23 = vmax.f32 %v356_v20, %v357_v19  ;;  %v365_v25 = vmax.f32 %v363_v16, %v364_v22  ;;  %v353_v45 = vmax.f32 %v351_v24, %v352_v31 }
 0x144   :  { %v359_v28 = vrot.slane %v358_v23, 2  ;;  %v366_v32 = vrot.slane %v365_v25, 2  ;;  %v354_v60 = vrot.slane %v353_v45, 1 }
 0x146   :  { %v360_v39 = vmax.f32 %v358_v23, %v359_v28  ;;  %v367_v47 = vmax.f32 %v365_v25, %v366_v32  ;;  %v355_v16 = vmax.f32 %v353_v45, %v354_v60 }
 0x147   :  { %v315_v26 = vpop.xlane.xlu1 %314 }
 0x148   :  { %v336_v30 = vadd.f32 %v787_v63, %v315_v26  ;;  %v312_v21 = vpop.xlane.xlu0 %311  ;;  %v361_v53 = vrot.slane %v360_v39, 1  ;;  %v368_v61 = vrot.slane %v367_v47, 1 }
 0x149   :  { %v335_v36 = vadd.f32 %v787_v63, %v312_v21 }
 0x14a   :  { %v1087_v35 = vsel %vm966_vm4, %v336_v30, -inf  ;;  %v362_v6 = vmax.f32 %v360_v39, %v361_v53  ;;  %v369_v18 = vmax.f32 %v367_v47, %v368_v61  ;;  %vm1217_vm4 = vmmov %vm1215_vm0 }
 0x14b   :  { %v377_v40 = vsel %vm41_vm9, %v1087_v35, -inf  ;;  %v321_v41 = vpop.xlane.xlu1 %320  ;;  %v1094_v44 = vsel %vm142_vm3, %v335_v36, -inf }
 0x14c   :  { %v378_v43 = vrot.slane %v377_v40, 4  ;;  %v338_v17 = vadd.f32 %v787_v63, %v321_v41  ;;  %v370_v33 = vsel %vm41_vm9, %v1094_v44, -inf  ;;  %v318_v49 = vpop.xlane.xlu0 %317  ;;  %v414_v28 = vsel %vm269_vm14, %v362_v6, %v355_v16 }
 0x14d   :  { %v371_v51 = vrot.slane %v370_v33, 4  ;;  %v337_v54 = vadd.f32 %v787_v63, %v318_v49  ;;  %v415_v21 = vsel %vm271_vm10, %v369_v18, %v414_v28 }
 0x14e   :  { %v379_v50 = vmax.f32 %v377_v40, %v378_v43  ;;  %v1101_v52 = vsel %vm145_vm6, %v338_v17, -inf }
 0x14f   :  { %v391_v29 = vsel %vm41_vm9, %v1101_v52, -inf  ;;  %v372_v57 = vmax.f32 %v370_v33, %v371_v51  ;;  %v1107_v62 = vsel %vm977_vm5, %v337_v54, -inf  ;;  %vm769_vm5 = vcmask 523520  }
 0x150   :  { %v380_v56 = vrot.slane %v379_v50, 2  ;;  %v392_v59 = vrot.slane %v391_v29, 4  ;;  %v324_v46 = vpop.xlane.xlu0 %323  ;;  %v384_v4 = vsel %vm41_vm9, %v1107_v62, -inf }
 0x151   :  { %v373_v2 = vrot.slane %v372_v57, 2  ;;  %v385_v8 = vrot.slane %v384_v4, 4  ;;  %v339_v9 = vadd.f32 %v787_v63, %v324_v46 }
 0x152   :  { %v381_v1 = vmax.f32 %v379_v50, %v380_v56  ;;  %v393_v34 = vmax.f32 %v391_v29, %v392_v59  ;;  %v405_v50 = vld [vmem:[#allocation2] sm:$0xff] }
 0x153   :  { %v374_v13 = vmax.f32 %v372_v57, %v373_v2  ;;  %v386_v19 = vmax.f32 %v384_v4, %v385_v8  ;;  %v1114_v37 = vsel %vm146_vm7, %v339_v9, -inf }
 0x154   :  { %v394_v20 = vrot.slane %v393_v34, 2  ;;  %v382_v22 = vrot.slane %v381_v1, 1  ;;  %v398_v25 = vsel %vm41_vm9, %v1114_v37, -inf }
 0x155   :  { %v375_v23 = vrot.slane %v374_v13, 1  ;;  %v387_v26 = vrot.slane %v386_v19, 2  ;;  %v399_v63 = vrot.slane %v398_v25, 4 }
 0x156   :  { %v395_v24 = vmax.f32 %v393_v34, %v394_v20  ;;  %v383_v36 = vmax.f32 %v381_v1, %v382_v22 }
 0x157   :  { %v376_v30 = vmax.f32 %v374_v13, %v375_v23  ;;  %v388_v31 = vmax.f32 %v386_v19, %v387_v26  ;;  %v400_v32 = vmax.f32 %v398_v25, %v399_v63 }
 0x158   :  { %v396_v39 = vrot.slane %v395_v24, 1 }
 0x159   :  { %v416_v5 = vsel %vm273_vm12, %v376_v30, %v415_v21  ;;  %v389_v38 = vrot.slane %v388_v31, 1  ;;  %v401_v40 = vrot.slane %v400_v32, 2 }
 0x15a   :  { %v397_v17 = vmax.f32 %v395_v24, %v396_v39  ;;  %v417_v45 = vsel %vm1215_vm0, %v383_v36, %v416_v5 }
 0x15b   :  { %v390_v41 = vmax.f32 %v388_v31, %v389_v38  ;;  %v402_v43 = vmax.f32 %v400_v32, %v401_v40 }
 0x15d   :  { %v418_v47 = vsel %vm277_vm15, %v390_v41, %v417_v45  ;;  %v403_v33 = vrot.slane %v402_v43, 1 }
 0x15e   :  { %v419_v51 = vsel %vm279_vm11, %v397_v17, %v418_v47 }
 0x15f   :  { %v404_v49 = vmax.f32 %v402_v43, %v403_v33 }
 0x161   :  { %v420_v53 = vsel %vm281_vm13, %v404_v49, %v419_v51 }
 0x162   :  { %v422_v29 = vmax.f32 %v405_v50, %v420_v53 }
 0x164   :  { %vm423_vm1 = vcmp.gt.f32.partialorder %v422_v29, -inf  ;;  %747 = vst.msk [vmem:[#allocation2] sm:$0xff] %vm41_vm9, %v422_v29 }
 0x165   :  { %v424_v54 = vsel %vm423_vm1, %v422_v29, 0.0 }
 0x166   :  { %v429_v56 = vcombine.high %v424_v54, %v424_v54  ;;  %v436_v57 = vrot.slane %v424_v54, %v920_v7 }
 0x168   :  { %v443_v59 = vrot.slane %v429_v56, %v920_v7  ;;  %v444_v60 = vcombine.high %v436_v57, %v436_v57  ;;  %v452_v61 = vrot.slane %v436_v57, %v920_v7 }
 0x16a   :  { %v445_v46 = vcombine.high %v443_v59, %v443_v59  ;;  %v459_v1 = vrot.slane %v443_v59, %v920_v7  ;;  %v466_v2 = vrot.slane %v444_v60, %v920_v7  ;;  %v474_v34 = vcombine.high %v452_v61, %v452_v61 }
 0x16b   :  { %v481_v4 = vrot.slane %v452_v61, %v927_v10 }
 0x16c   :  { %v473_v6 = vrot.slane %v445_v46, %v920_v7  ;;  %v475_v8 = vcombine.high %v459_v1, %v459_v1  ;;  %v476_v9 = vcombine.high %v466_v2, %v466_v2  ;;  %v485_v13 = vrot.slane %v466_v2, %v927_v10 }
 0x16d   :  { %v489_v20 = vrot.slane %v474_v34, %v927_v10  ;;  %v497_v16 = vrot.slane %v459_v1, %v927_v10  ;;  %v518_v18 = vsub.f32 %v1068_v3, %v481_v4 }
 0x16e   :  { %v477_v19 = vcombine.high %v473_v6, %v473_v6  ;;  %v501_v22 = vrot.slane %v473_v6, %v927_v10  ;;  %v505_v23 = vrot.slane %v475_v8, %v927_v10  ;;  %v519_v24 = vsub.f32 %v1074_v14, %v485_v13 }
 0x16f   :  { %v522_v25 = vsub.f32 %v1087_v35, %v497_v16  ;;  %v526_v7 = vmul.f32 1.442695, %v518_v18  ;;  %v520_v28 = vsub.f32 %v1079_v15, %v489_v20  ;;  %v493_v26 = vrot.slane %v476_v9, %v927_v10 }
 0x170   :  { %v509_v63 = vrot.slane %v477_v19, %v927_v10  ;;  %v523_v30 = vsub.f32 %v1107_v62, %v501_v22  ;;  %v524_v3 = vsub.f32 %v1101_v52, %v505_v23  ;;  %v528_v31 = vmul.f32 1.442695, %v519_v24 }
 0x171   :  { %v534_v32 = vmul.f32 1.442695, %v522_v25  ;;  %800 = vpow2.f32 %v526_v7  ;;  %v521_v21 = vsub.f32 %v1094_v44, %v493_v26  ;;  %v530_v15 = vmul.f32 1.442695, %v520_v28 }
 0x172   :  { %v525_v14 = vsub.f32 %v1114_v37, %v509_v63  ;;  %v536_v36 = vmul.f32 1.442695, %v523_v30  ;;  %v538_v35 = vmul.f32 1.442695, %v524_v3  ;;  %802 = vpow2.f32 %v528_v31 }
 0x173   :  { %804 = vpow2.f32 %v534_v32  ;;  %v532_v5 = vmul.f32 1.442695, %v521_v21  ;;  %v425_v10 = vsub.f32 %v405_v50, %v424_v54 }
 0x174   :  { %806 = vpow2.f32 %v536_v36  ;;  %v540_v39 = vmul.f32 1.442695, %v525_v14 }
 0x175   :  { %808 = vpow2.f32 %v538_v35  ;;  %v426_v52 = vmul.f32 1.442695, %v425_v10 }
 0x176   :  { %810 = vpow2.f32 %v540_v39 }
 0x177   :  { %812 = vpow2.f32 %v530_v15 }
 0x178   :  { %814 = vpow2.f32 %v532_v5 }
 0x179   :  { %816 = vpow2.f32 %v426_v52  ;;  %v764_v52 = vld [vmem:[#allocation5] sm:$0xff] }
 0x17b   :  { %v801_v62 = vpop.eup %800 }
 0x17c   :  { %v803_v38 = vpop.eup %802  ;;  %627 = vperm.xlu1 %798, %v801_v62   ;;  %v544_v44 = vsel %vm41_vm9, %v801_v62, 0.0 }
 0x17d   :  { %v805_v37 = vpop.eup %804  ;;  %v545_v40 = vrot.slane %v544_v44, 4  ;;  %632 = vperm.xlu0 %797, %v803_v38   ;;  %v551_v41 = vsel %vm41_vm9, %v803_v38, 0.0 }
 0x17e   :  { %v807_v43 = vpop.eup %806  ;;  %v572_v17 = vsel %vm41_vm9, %v805_v37, 0.0  ;;  %v552_v45 = vrot.slane %v551_v41, 4 }
 0x17f   :  { %v809_v47 = vpop.eup %808  ;;  %v573_v33 = vrot.slane %v572_v17, 4  ;;  %v579_v49 = vsel %vm41_vm9, %v807_v43, 0.0  ;;  %v546_v50 = vadd.f32 %v545_v40, %v544_v44 }
 0x180   :  { %v811_v51 = vpop.eup %810  ;;  %v580_v53 = vrot.slane %v579_v49, 4  ;;  %v586_v29 = vsel %vm41_vm9, %v809_v47, 0.0  ;;  %v553_v54 = vadd.f32 %v552_v45, %v551_v41 }
 0x181   :  { %v813_v56 = vpop.eup %812  ;;  %v574_v57 = vadd.f32 %v573_v33, %v572_v17  ;;  %v587_v59 = vrot.slane %v586_v29, 4  ;;  %v593_v60 = vsel %vm41_vm9, %v811_v51, 0.0  ;;  %v547_v61 = vrot.slane %v546_v50, 2  ;;  %647 = vperm.xlu0 %797, %v805_v37  }
 0x182   :  { %v815_v46 = vpop.eup %814  ;;  %v581_v1 = vadd.f32 %v580_v53, %v579_v49  ;;  %v594_v2 = vrot.slane %v593_v60, 4  ;;  %v554_v34 = vrot.slane %v553_v54, 2  ;;  %637 = vperm.xlu1 %798, %v813_v56   ;;  %v558_v4 = vsel %vm41_vm9, %v813_v56, 0.0 }
 0x183   :  { %v588_v6 = vadd.f32 %v587_v59, %v586_v29  ;;  %v548_v8 = vadd.f32 %v547_v61, %v546_v50  ;;  %v559_v9 = vrot.slane %v558_v4, 4  ;;  %v565_v16 = vsel %vm41_vm9, %v815_v46, 0.0  ;;  %v817_v26 = vpop.eup %816 }
 0x184   :  { %v595_v13 = vadd.f32 %v594_v2, %v593_v60  ;;  %v555_v20 = vadd.f32 %v554_v34, %v553_v54  ;;  %v575_v18 = vrot.slane %v574_v57, 2  ;;  %v582_v22 = vrot.slane %v581_v1, 2 }
 0x185   :  { %v560_v19 = vadd.f32 %v559_v9, %v558_v4  ;;  %657 = vperm.xlu0 %797, %v809_v47   ;;  %v549_v23 = vrot.slane %v548_v8, 1  ;;  %v566_v25 = vrot.slane %v565_v16, 4  ;;  %v589_v7 = vrot.slane %v588_v6, 2  ;;  %v542_v47 = vld [vmem:[#allocation3] sm:$0xff] }
 0x186   :  { %v556_v24 = vrot.slane %v555_v20, 1  ;;  %642 = vperm.xlu1 %798, %v815_v46   ;;  %v596_v63 = vrot.slane %v595_v13, 2  ;;  %v576_v31 = vadd.f32 %v575_v18, %v574_v57  ;;  %v583_v21 = vadd.f32 %v582_v22, %v581_v1 }
 0x187   :  { %v561_v28 = vrot.slane %v560_v19, 2  ;;  %v567_v3 = vadd.f32 %v566_v25, %v565_v16  ;;  %v550_v14 = vadd.f32 %v549_v23, %v548_v8  ;;  %v590_v35 = vadd.f32 %v589_v7, %v588_v6 }
 0x188   :  { %v557_v30 = vadd.f32 %v556_v24, %v555_v20  ;;  %v597_v39 = vadd.f32 %v596_v63, %v595_v13  ;;  %v577_v62 = vrot.slane %v576_v31, 1  ;;  %v584_v44 = vrot.slane %v583_v21, 1 }
 0x189   :  { %v562_v32 = vadd.f32 %v561_v28, %v560_v19  ;;  %621 = vperm.xlu0 %797, %v817_v26   ;;  %v568_v36 = vrot.slane %v567_v3, 2  ;;  %v591_v40 = vrot.slane %v590_v35, 1  ;;  %v543_v56 = vmul.f32 %v817_v26, %v542_v47 }
 0x18a   :  { %652 = vperm.xlu1 %798, %v807_v43   ;;  %v608_v5 = vsel %vm269_vm14, %v557_v30, %v550_v14  ;;  %v598_v17 = vrot.slane %v597_v39, 1  ;;  %v578_v43 = vadd.f32 %v577_v62, %v576_v31  ;;  %v585_v33 = vadd.f32 %v584_v44, %v583_v21 }
 0x18b   :  { %v563_v15 = vrot.slane %v562_v32, 1  ;;  %v569_v10 = vadd.f32 %v568_v36, %v567_v3  ;;  %v592_v50 = vadd.f32 %v591_v40, %v590_v35 }
 0x18c   :  { %v599_v29 = vadd.f32 %v598_v17, %v597_v39 }
 0x18d   :  { %v564_v38 = vadd.f32 %v563_v15, %v562_v32  ;;  %766 = vrot.lane.b32.xlu0 %v764_v52, %s875_s2  ;;  %v570_v37 = vrot.slane %v569_v10, 1 }
 0x18e   :  { %662 = vperm.xlu1 %798, %v811_v51  }
 0x18f   :  { %v609_v41 = vsel %vm271_vm10, %v564_v38, %v608_v5  ;;  %v571_v45 = vadd.f32 %v570_v37, %v569_v10 }
 0x191   :  { %v610_v49 = vsel %vm273_vm12, %v571_v45, %v609_v41 }
 0x192   :  { %v611_v53 = vsel %vm1216_vm2, %v578_v43, %v610_v49 }
 0x193   :  { %v612_v54 = vsel %vm277_vm15, %v585_v33, %v611_v53 }
 0x194   :  { %v613_v57 = vsel %vm279_vm11, %v592_v50, %v612_v54 }
 0x195   :  { %v614_v51 = vsel %vm281_vm13, %v599_v29, %v613_v57 }
 0x196   :  { %v616_v59 = vadd.f32 %v614_v51, %v543_v56 }
 0x198   :  { %617 = vst.msk [vmem:[#allocation3] sm:$0xff] %vm41_vm9, %v616_v59 }
 0x19f   :  { %v751_v60 = vld [vmem:[#allocation3] sm:$0xff] }
 0x1a0   :  { %vm752_vm3 = vcmp.gt.f32.partialorder %v751_v60, 0.0 }
 0x1a1   :  { %v753_v61 = vsel %vm752_vm3, %v751_v60, 1.0 }
 0x1a2   :  { %818 = vrcp.f32 %v753_v61 }
 0x1ac   :  { %v819_v46 = vpop.eup %818 }
 0x1ad   :  { %759 = vperm.xlu1 %798, %v819_v46  }
 0x1fb   :  { %v628_v1 = vpop.permute.xlu1 %627 }
 0x1fc   :  { %v665_v2 = vmul.f32 %v628_v1, %v1005_v48  ;;  %v633_v34 = vpop.permute.xlu0 %632 }
 0x1fd   :  { %v666_v4 = vmul.f32 %v633_v34, %v1016_v0 }
 0x1fe   :  { %v673_v6 = vsel %vm38_vm8, %v665_v2, 0.0 }
 0x1ff   :  { %v674_v8 = vrot.slane %v673_v6, 4  ;;  %v680_v9 = vsel %vm38_vm8, %v666_v4, 0.0 }
 0x200   :  { %v681_v13 = vrot.slane %v680_v9, 4  ;;  %v648_v20 = vpop.permute.xlu0 %647 }
 0x201   :  { %v675_v16 = vadd.f32 %v674_v8, %v673_v6  ;;  %v638_v18 = vpop.permute.xlu1 %637  ;;  %v669_v19 = vmul.f32 %v648_v20, %v1030_v27 }
 0x202   :  { %v682_v22 = vadd.f32 %v681_v13, %v680_v9  ;;  %v667_v23 = vmul.f32 %v638_v18, %v1010_v55 }
 0x203   :  { %v676_v24 = vrot.slane %v675_v16, 2  ;;  %v701_v48 = vsel %vm38_vm8, %v669_v19, 0.0  ;;  %v618_v19 = vld [vmem:[#allocation4] sm:$0xff] }
 0x204   :  { %v683_v25 = vrot.slane %v682_v22, 2  ;;  %v687_v0 = vsel %vm38_vm8, %v667_v23, 0.0  ;;  %v702_v7 = vrot.slane %v701_v48, 4  ;;  %v658_v28 = vpop.permute.xlu0 %657 }
 0x205   :  { %v688_v26 = vrot.slane %v687_v0, 4  ;;  %v643_v63 = vpop.permute.xlu1 %642  ;;  %v671_v30 = vmul.f32 %v658_v28, %v1036_v58  ;;  %v677_v27 = vadd.f32 %v676_v24, %v675_v16 }
 0x206   :  { %v684_v3 = vadd.f32 %v683_v25, %v682_v22  ;;  %v703_v31 = vadd.f32 %v702_v7, %v701_v48  ;;  %v668_v32 = vmul.f32 %v643_v63, %v1022_v12 }
 0x207   :  { %v689_v21 = vadd.f32 %v688_v26, %v687_v0  ;;  %v715_v55 = vsel %vm38_vm8, %v671_v30, 0.0  ;;  %v678_v58 = vrot.slane %v677_v27, 1 }
 0x208   :  { %v694_v14 = vsel %vm38_vm8, %v668_v32, 0.0  ;;  %v716_v36 = vrot.slane %v715_v55, 4  ;;  %v685_v35 = vrot.slane %v684_v3, 1  ;;  %v704_v10 = vrot.slane %v703_v31, 2  ;;  %v622_v18 = vpop.permute.xlu0 %621 }
 0x209   :  { %v690_v15 = vrot.slane %v689_v21, 2  ;;  %v695_v39 = vrot.slane %v694_v14, 4  ;;  %v653_v5 = vpop.permute.xlu1 %652  ;;  %v679_v49 = vadd.f32 %v678_v58, %v677_v27  ;;  %v624_v48 = vmul.f32 %v622_v18, %v618_v19 }
 0x20a   :  { %v717_v52 = vadd.f32 %v716_v36, %v715_v55  ;;  %v670_v62 = vmul.f32 %v653_v5, %v1033_v42  ;;  %v686_v37 = vadd.f32 %v685_v35, %v684_v3  ;;  %v705_v43 = vadd.f32 %v704_v10, %v703_v31 }
 0x20b   :  { %v691_v38 = vadd.f32 %v690_v15, %v689_v21  ;;  %v696_v44 = vadd.f32 %v695_v39, %v694_v14 }
 0x20c   :  { %v708_v12 = vsel %vm38_vm8, %v670_v62, 0.0  ;;  %v718_v47 = vrot.slane %v717_v52, 2  ;;  %v737_v54 = vsel %vm269_vm14, %v686_v37, %v679_v49  ;;  %v706_v59 = vrot.slane %v705_v43, 1  ;;  %v767_v30 = vpop.permute.xlu0 %766 }
 0x20d   :  { %v692_v40 = vrot.slane %v691_v38, 1  ;;  %v697_v41 = vrot.slane %v696_v44, 2  ;;  %v709_v17 = vrot.slane %v708_v12, 4  ;;  %v663_v45 = vpop.permute.xlu1 %662 }
 0x20e   :  { %v672_v33 = vmul.f32 %v663_v45, %v1041_v11  ;;  %v719_v60 = vadd.f32 %v718_v47, %v717_v52  ;;  %v707_v6 = vadd.f32 %v706_v59, %v705_v43 }
 0x20f   :  { %v698_v50 = vadd.f32 %v697_v41, %v696_v44  ;;  %v710_v53 = vadd.f32 %v709_v17, %v708_v12  ;;  %v693_v29 = vadd.f32 %v692_v40, %v691_v38 }
 0x210   :  { %v722_v42 = vsel %vm38_vm8, %v672_v33, 0.0  ;;  %v720_v8 = vrot.slane %v719_v60, 1 }
 0x211   :  { %v699_v56 = vrot.slane %v698_v50, 1  ;;  %v711_v57 = vrot.slane %v710_v53, 2  ;;  %v723_v51 = vrot.slane %v722_v42, 4  ;;  %v738_v2 = vsel %vm271_vm10, %v693_v29, %v737_v54 }
 0x212   :  { %v721_v23 = vadd.f32 %v720_v8, %v719_v60 }
 0x213   :  { %v700_v61 = vadd.f32 %v699_v56, %v698_v50  ;;  %v712_v46 = vadd.f32 %v711_v57, %v710_v53  ;;  %v724_v1 = vadd.f32 %v723_v51, %v722_v42 }
 0x215   :  { %v739_v11 = vsel %vm273_vm12, %v700_v61, %v738_v2  ;;  %v713_v34 = vrot.slane %v712_v46, 1  ;;  %v725_v4 = vrot.slane %v724_v1, 2 }
 0x216   :  { %v740_v20 = vsel %vm1217_vm4, %v707_v6, %v739_v11 }
 0x217   :  { %v714_v9 = vadd.f32 %v713_v34, %v712_v46  ;;  %v726_v13 = vadd.f32 %v725_v4, %v724_v1 }
 0x219   :  { %v741_v16 = vsel %vm277_vm15, %v714_v9, %v740_v20  ;;  %v727_v22 = vrot.slane %v726_v13, 1 }
 0x21a   :  { %v742_v25 = vsel %vm279_vm11, %v721_v23, %v741_v16 }
 0x21b   :  { %v728_v24 = vadd.f32 %v727_v22, %v726_v13 }
 0x21d   :  { %v743_v0 = vsel %vm281_vm13, %v728_v24, %v742_v25 }
 0x21e   :  { %v745_v7 = vadd.f32 %v743_v0, %v624_v48 }
 0x220   :  { %746 = vst.msk [vmem:[#allocation4] sm:$0xff] %vm38_vm8, %v745_v7 }
 0x227   :  { %v754_v26 = vld [vmem:[#allocation4] sm:$0xff] }
 0x22c   :  { %v760_v28 = vpop.permute.xlu1 %759 }
 0x22d   :  { %v762_v63 = vmul.f32 %v760_v28, %v754_v26 }
 0x22f   :  { %763 = vst.msk [vmem:[#allocation10] sm:$0xff] %vm38_vm8, %v762_v63 }
 0x230   :  { %770 = vst.msk [vmem:[#allocation10] sm:$0xff] %vm769_vm5, %v767_v30 }
 0x231   :  { %853 = shalt.err (!%p850_p12)
}
 0x232   :  { %s854_s11 = scalar_lea.hbm %s1205_s4, 128 }
 0x233   :  { %p855_p13 = scmp.ne.s32.totalorder %s1205_s4, %s854_s11  ;;  %p858_p0 = scmp.lt.u32.totalorder %s854_s11, %s1205_s4 }
 0x235   :  { %p860_p1 = pnand %p858_p0, %p855_p13 }
 0x237   :  { %863 = shalt.err (!%p860_p1)
}
 0x238   :  { %780 = dma.vmem_to_hbm [thread:$0]  %s778_s7, 128, %s1205_s4, [#allocation9]  }
 0x239   :  { %866 = dma.done.wait [#allocation9], 128  }
 0x23a   :  { %867 = vsyncadd [#allocation9], 4294967168 }
 0x23b   :  { %784 = vsyncpa [#allocation8], 1 }
 0x23c   :  { %785 = vsyncpa [#allocation9], 1 }

</bundles_post_ra>
